<compile_context>
chip_gen: v7x
topology: tpu7x:2x2x1
jax: 0.10.0
libtpu: 0.0.40
codegen_flags: <defaults>
</compile_context>

<pallas_src>
import functools

import jax
import jax.numpy as jnp
from jax.experimental import pallas as pl
from jax.experimental.pallas import tpu as pltpu


IN_FEATURES = 784   # 28*28, fed at full width (legal BlockSpec: last dim == full dim)
H1 = 256            # hidden 1 (already lane-dense)
H2_PAD = 128        # hidden 2 padded from 64 to a lane-dense width
MIN_OUT_PAD = 128   # minimum lane-dense output width


def _ceil_to(x, m):
    return ((x + m - 1) // m) * m


def _num_tensorcores():
    """Best-effort TC-per-device count: 2 on megacore-style parts (v7x/v4/v5p), else 1."""
    try:
        kind = jax.devices()[0].device_kind.lower()
    except Exception:
        return 1
    if "lite" in kind or "v5e" in kind or "v6e" in kind:
        return 1
    return 2 if any(tag in kind for tag in ("v7", "7x", "v4", "v5p")) else 1


def mlp_kernel(x_ref, w1_ref, b1_ref, w2_ref, b2_ref, w3_ref, b3_ref, o_ref):
    # x arrives f32 straight from HBM; cast to bf16 on the VPU (free under a
    # DMA-bound kernel) right before the MXU matmul.
    x = x_ref[...].astype(jnp.bfloat16)
    # fc1 + relu  (bf16 x bf16 -> f32 accumulate)
    h1 = jnp.dot(x, w1_ref[...], preferred_element_type=jnp.float32)
    h1 = jnp.maximum(h1 + b1_ref[...], 0.0)
    # fc2 + relu
    h2 = jnp.dot(h1.astype(jnp.bfloat16), w2_ref[...],
                 preferred_element_type=jnp.float32)
    h2 = jnp.maximum(h2 + b2_ref[...], 0.0)
    # fc3 (no activation), lane-dense padded output
    out = jnp.dot(h2.astype(jnp.bfloat16), w3_ref[...],
                  preferred_element_type=jnp.float32)
    o_ref[...] = (out + b3_ref[...]).astype(o_ref.dtype)


def prepare_params(w1, b1, w2, b2, w3, b3):
    """One-time (model-load) conversion. Weights are (in, out); biases are (out,).
    Returns padded bf16 weights + (1, N) f32 bias rows, and the true output dim."""
    out_dim = int(w3.shape[1])
    out_pad = _ceil_to(max(out_dim, MIN_OUT_PAD), 128)
    w1p = jnp.asarray(w1, jnp.bfloat16)                                           # (784, 256)
    w2p = jnp.pad(w2, ((0, 0), (0, H2_PAD - w2.shape[1]))).astype(jnp.bfloat16)   # (256, 128)
    w3p = jnp.pad(w3, ((0, H2_PAD - w3.shape[0]),
                       (0, out_pad - out_dim))).astype(jnp.bfloat16)              # (128, out_pad)
    b1r = jnp.asarray(b1, jnp.float32).reshape(1, -1)                             # (1, 256)
    b2r = jnp.pad(b2.reshape(1, -1),
                  ((0, 0), (0, H2_PAD - b2.shape[0]))).astype(jnp.float32)        # (1, 128)
    b3r = jnp.pad(b3.reshape(1, -1),
                  ((0, 0), (0, out_pad - out_dim))).astype(jnp.float32)           # (1, out_pad)
    return (w1p, b1r, w2p, b2r, w3p, b3r), out_dim


@functools.partial(jax.jit, static_argnames=("out_dim", "tile_b"))
def mnist_mlp_forward(x, params, *, out_dim, tile_b=1024):
    """x: (B, 1, 28, 28) or (B, 784) f32. params: output of prepare_params()."""
    w1p, b1r, w2p, b2r, w3p, b3r = params
    x2 = x.reshape(-1, IN_FEATURES).astype(jnp.float32)   # x.view(-1, 784)
    B = x2.shape[0]
    out_pad = w3p.shape[1]

    # ---- batch tiling (generation-aware; pad the batch instead of asserting) ----
    eff_tile = _ceil_to(min(tile_b, _ceil_to(B, 8)), 8)
    num_tc = _num_tensorcores()
    if num_tc > 1:
        # Megacore: aim for >= 2*num_tc grid steps once the batch is big enough so
        # both TensorCores stay load-balanced; never shrink tiles below ~256 rows.
        target_steps = 2 * num_tc
        if B >= target_steps * 256:
            steps = max(-(-B // eff_tile), target_steps)
            eff_tile = _ceil_to(-(-B // steps), 8)
    b_pad = _ceil_to(B, eff_tile)
    grid = (b_pad // eff_tile,)

    # Only batch-row padding; x stays f32 at full 784 width (no pad/cast HBM pass).
    xp = x2 if b_pad == B else jnp.pad(x2, ((0, b_pad - B), (0, 0)))

    resident = lambda shape: pl.BlockSpec(shape, lambda i: (0, 0))

    out = pl.pallas_call(
        mlp_kernel,
        out_shape=jax.ShapeDtypeStruct((b_pad, out_pad), jnp.float32),
        grid=grid,
        in_specs=[
            # x tile over the batch; last dim == full array dim (784) is legal.
            pl.BlockSpec((eff_tile, IN_FEATURES), lambda i: (i, 0)),
            resident((IN_FEATURES, H1)),   # w1 (784, 256) resident in VMEM
            resident((1, H1)),             # b1
            resident((H1, H2_PAD)),        # w2 (256, 128)
            resident((1, H2_PAD)),         # b2
            resident((H2_PAD, out_pad)),   # w3 (128, out_pad)
            resident((1, out_pad)),        # b3
        ],
        out_specs=pl.BlockSpec((eff_tile, out_pad), lambda i: (i, 0)),
        compiler_params=pltpu.CompilerParams(
            dimension_semantics=("parallel",),
        ),
    )(xp, w1p, b1r, w2p, b2r, w3p, b3r)

    return out[:B, :out_dim]


def init_linear_params(key, in_features, out_features):
    """Deterministic init mirroring nn.Linear's default U(-1/sqrt(in), 1/sqrt(in)).
    Returns weight already transposed to (in, out)."""
    kw, kb = jax.random.split(key)
    bound = 1.0 / (in_features ** 0.5)
    w = jax.random.uniform(kw, (in_features, out_features), jnp.float32, -bound, bound)
    b = jax.random.uniform(kb, (out_features,), jnp.float32, -bound, bound)
    return w, b


def reference_forward_bf16(x, w1, b1, w2, b2, w3, b3):
    """Pure-JAX reference mirroring the kernel's bf16-operand / f32-accumulate numerics."""
    f32, bf16 = jnp.float32, jnp.bfloat16
    x2 = x.reshape(-1, 784).astype(bf16)
    h1 = jnp.maximum(jnp.dot(x2, w1.astype(bf16), preferred_element_type=f32) + b1, 0.0)
    h2 = jnp.maximum(
        jnp.dot(h1.astype(bf16), w2.astype(bf16), preferred_element_type=f32) + b2, 0.0)
    return jnp.dot(h2.astype(bf16), w3.astype(bf16), preferred_element_type=f32) + b3


if __name__ == "__main__":
    key = jax.random.PRNGKey(0)
    k_x, k1, k2, k3 = jax.random.split(key, 4)

    output_dim = 10     # MNIST classes
    batch = 8

    # MNIST-shaped input, NCHW: (B, 1, 28, 28) -> flattened to (B, 784) by forward.
    x = jax.random.normal(k_x, (batch, 1, 28, 28), jnp.float32)

    w1, b1 = init_linear_params(k1, 784, 256)
    w2, b2 = init_linear_params(k2, 256, 64)
    w3, b3 = init_linear_params(k3, 64, output_dim)

    # One-time weight conversion (pad + bf16 cast) hoisted out of the forward path.
    params, out_dim = prepare_params(w1, b1, w2, b2, w3, b3)

    out = mnist_mlp_forward(x, params, out_dim=out_dim)
    out = jax.block_until_ready(out)

    ref = reference_forward_bf16(x, w1, b1, w2, b2, w3, b3)
    assert out.shape == (batch, output_dim), out.shape
    assert jnp.allclose(out, ref, atol=1e-2, rtol=1e-2), "mismatch vs pure-JAX reference"

    print("KERNEL_OK")
</pallas_src>

<mosaic_0001>
module attributes {stable_mosaic.version = 11 : i64} {
  func.func @mlp_kernel(%arg0: i32, %arg1: memref<8x784xf32, #tpu.memory_space<vmem>>, %arg2: memref<784x256xbf16, #tpu.memory_space<vmem>>, %arg3: memref<1x256xf32, #tpu.memory_space<vmem>>, %arg4: memref<256x128xbf16, #tpu.memory_space<vmem>>, %arg5: memref<1x128xf32, #tpu.memory_space<vmem>>, %arg6: memref<128x128xbf16, #tpu.memory_space<vmem>>, %arg7: memref<1x128xf32, #tpu.memory_space<vmem>>, %arg8: memref<8x128xf32, #tpu.memory_space<vmem>>) attributes {dimension_semantics = [#tpu.dimension_semantics<parallel>], iteration_bounds = array<i64: 1>, scalar_prefetch = 0 : i64, scratch_operands = 0 : i64, tpu.core_type = #tpu.core_type<tc>, window_params = [{transform_indices = @transform_0, window_bounds = array<i64: 8, 784>}, {pipeline_mode = #tpu.pipeline_mode<synchronous>, transform_indices = @transform_1, window_bounds = array<i64: 784, 256>}, {pipeline_mode = #tpu.pipeline_mode<synchronous>, transform_indices = @transform_2, window_bounds = array<i64: 1, 256>}, {pipeline_mode = #tpu.pipeline_mode<synchronous>, transform_indices = @transform_3, window_bounds = array<i64: 256, 128>}, {pipeline_mode = #tpu.pipeline_mode<synchronous>, transform_indices = @transform_4, window_bounds = array<i64: 1, 128>}, {pipeline_mode = #tpu.pipeline_mode<synchronous>, transform_indices = @transform_5, window_bounds = array<i64: 128, 128>}, {pipeline_mode = #tpu.pipeline_mode<synchronous>, transform_indices = @transform_6, window_bounds = array<i64: 1, 128>}, {transform_indices = @transform_7, window_bounds = array<i64: 8, 128>}]} {
    %c0 = arith.constant 0 : index
    %c0_0 = arith.constant 0 : index
    %0 = vector.load %arg1[%c0, %c0_0] : memref<8x784xf32, #tpu.memory_space<vmem>>, vector<8x784xf32>
    %1 = arith.truncf %0 : vector<8x784xf32> to vector<8x784xbf16>
    %c0_1 = arith.constant 0 : index
    %c0_2 = arith.constant 0 : index
    %2 = vector.load %arg2[%c0_1, %c0_2] : memref<784x256xbf16, #tpu.memory_space<vmem>>, vector<784x256xbf16>
    %cst = arith.constant dense<0.000000e+00> : vector<8x256xf32>
    %3 = tpu.matmul %1, %2, %cst {dimension_numbers = #tpu.dot_dimension_numbers<[1], [0], [0], [1], [0, 0, 1, 1], [], []>} : vector<8x784xbf16>, vector<784x256xbf16>, vector<8x256xf32> -> vector<8x256xf32>
    %c0_3 = arith.constant 0 : index
    %c0_4 = arith.constant 0 : index
    %4 = vector.load %arg3[%c0_3, %c0_4] : memref<1x256xf32, #tpu.memory_space<vmem>>, vector<1x256xf32>
    %5 = vector.broadcast %4 : vector<1x256xf32> to vector<8x256xf32>
    %6 = arith.addf %3, %5 : vector<8x256xf32>
    %cst_5 = arith.constant 0.000000e+00 : f32
    %7 = vector.broadcast %cst_5 : f32 to vector<8x256xf32>
    %8 = arith.maximumf %6, %7 : vector<8x256xf32>
    %9 = arith.truncf %8 : vector<8x256xf32> to vector<8x256xbf16>
    %c0_6 = arith.constant 0 : index
    %c0_7 = arith.constant 0 : index
    %10 = vector.load %arg4[%c0_6, %c0_7] : memref<256x128xbf16, #tpu.memory_space<vmem>>, vector<256x128xbf16>
    %cst_8 = arith.constant dense<0.000000e+00> : vector<8x128xf32>
    %11 = tpu.matmul %9, %10, %cst_8 {dimension_numbers = #tpu.dot_dimension_numbers<[1], [0], [0], [1], [0, 0, 1, 1], [], []>} : vector<8x256xbf16>, vector<256x128xbf16>, vector<8x128xf32> -> vector<8x128xf32>
    %c0_9 = arith.constant 0 : index
    %c0_10 = arith.constant 0 : index
    %12 = vector.load %arg5[%c0_9, %c0_10] : memref<1x128xf32, #tpu.memory_space<vmem>>, vector<1x128xf32>
    %13 = vector.broadcast %12 : vector<1x128xf32> to vector<8x128xf32>
    %14 = arith.addf %11, %13 : vector<8x128xf32>
    %cst_11 = arith.constant 0.000000e+00 : f32
    %15 = vector.broadcast %cst_11 : f32 to vector<8x128xf32>
    %16 = arith.maximumf %14, %15 : vector<8x128xf32>
    %17 = arith.truncf %16 : vector<8x128xf32> to vector<8x128xbf16>
    %c0_12 = arith.constant 0 : index
    %c0_13 = arith.constant 0 : index
    %18 = vector.load %arg6[%c0_12, %c0_13] : memref<128x128xbf16, #tpu.memory_space<vmem>>, vector<128x128xbf16>
    %cst_14 = arith.constant dense<0.000000e+00> : vector<8x128xf32>
    %19 = tpu.matmul %17, %18, %cst_14 {dimension_numbers = #tpu.dot_dimension_numbers<[1], [0], [0], [1], [0, 0, 1, 1], [], []>} : vector<8x128xbf16>, vector<128x128xbf16>, vector<8x128xf32> -> vector<8x128xf32>
    %c0_15 = arith.constant 0 : index
    %c0_16 = arith.constant 0 : index
    %20 = vector.load %arg7[%c0_15, %c0_16] : memref<1x128xf32, #tpu.memory_space<vmem>>, vector<1x128xf32>
    %21 = vector.broadcast %20 : vector<1x128xf32> to vector<8x128xf32>
    %22 = arith.addf %19, %21 : vector<8x128xf32>
    %c0_17 = arith.constant 0 : index
    %c0_18 = arith.constant 0 : index
    %23 = vector.load %arg8[%c0_17, %c0_18] : memref<8x128xf32, #tpu.memory_space<vmem>>, vector<8x128xf32>
    tpu.vector_store %arg8[%c0_17, %c0_18], %22 {strides = array<i32>} : memref<8x128xf32, #tpu.memory_space<vmem>>, vector<8x128xf32>,
    return
  }
  func.func @transform_0(%arg0: i32) -> (i32, i32) {
    %c0_i32 = arith.constant 0 : i32
    %c0_i32_0 = arith.constant 0 : i32
    return %arg0, %c0_i32 : i32, i32
  }
  func.func @transform_1(%arg0: i32) -> (i32, i32) {
    %c0_i32 = arith.constant 0 : i32
    %c0_i32_0 = arith.constant 0 : i32
    %c0_i32_1 = arith.constant 0 : i32
    return %c0_i32, %c0_i32_0 : i32, i32
  }
  func.func @transform_2(%arg0: i32) -> (i32, i32) {
    %c0_i32 = arith.constant 0 : i32
    %c0_i32_0 = arith.constant 0 : i32
    %c0_i32_1 = arith.constant 0 : i32
    return %c0_i32, %c0_i32_0 : i32, i32
  }
  func.func @transform_3(%arg0: i32) -> (i32, i32) {
    %c0_i32 = arith.constant 0 : i32
    %c0_i32_0 = arith.constant 0 : i32
    %c0_i32_1 = arith.constant 0 : i32
    return %c0_i32, %c0_i32_0 : i32, i32
  }
  func.func @transform_4(%arg0: i32) -> (i32, i32) {
    %c0_i32 = arith.constant 0 : i32
    %c0_i32_0 = arith.constant 0 : i32
    %c0_i32_1 = arith.constant 0 : i32
    return %c0_i32, %c0_i32_0 : i32, i32
  }
  func.func @transform_5(%arg0: i32) -> (i32, i32) {
    %c0_i32 = arith.constant 0 : i32
    %c0_i32_0 = arith.constant 0 : i32
    %c0_i32_1 = arith.constant 0 : i32
    return %c0_i32, %c0_i32_0 : i32, i32
  }
  func.func @transform_6(%arg0: i32) -> (i32, i32) {
    %c0_i32 = arith.constant 0 : i32
    %c0_i32_0 = arith.constant 0 : i32
    %c0_i32_1 = arith.constant 0 : i32
    return %c0_i32, %c0_i32_0 : i32, i32
  }
  func.func @transform_7(%arg0: i32) -> (i32, i32) {
    %c0_i32 = arith.constant 0 : i32
    %c0_i32_0 = arith.constant 0 : i32
    return %arg0, %c0_i32 : i32, i32
  }
}

</mosaic_0001>

<bundles_post_ra>
// kernel: mnist_mlp_forward.1
= control target key start
LH: loop header
LB: loop body
LE: loop exit
PB: predicated region body
PF: predicated region fallthrough
CT: control target
= control target key end

     0   :  { %12 = vsyncpa [#allocation3], 0  ;;  %s1994_s0 = inlined_call_operand.vmem [shape: f32[8,784], index: 0, kind: input, shape index: {}]   ;;  %s1995_s1 = inlined_call_operand.vmem [shape: bf16[784,256], index: 1, kind: input, shape index: {}]   ;;  %s1996_s2 = inlined_call_operand.vmem [shape: f32[1,256], index: 2, kind: input, shape index: {}]   ;;  %s1997_s3 = inlined_call_operand.hbm [shape: bf16[256,128], index: 3, kind: input, shape index: {}]   ;;  %s1998_s4 = inlined_call_operand.vmem [shape: f32[1,128], index: 4, kind: input, shape index: {}]   ;;  %s1999_s5 = inlined_call_operand.hbm [shape: bf16[128,128], index: 5, kind: input, shape index: {}]   ;;  %s2000_s6 = inlined_call_operand.vmem [shape: f32[1,128], index: 6, kind: input, shape index: {}]   ;;  %s2001_s7 = inlined_call_operand.hbm [shape: f32[8,128], index: 7, kind: output, shape index: {}]  }
   0x1   :  { %13 = vsyncpa [#allocation6], 0 }
   0x2   :  { %14 = vsyncpa [#allocation4], 0  ;;  %s1586_s24 = smov [#allocation2]   ;;  %s1514_s28 = scalar_lea.hbm %s1997_s3, 2048 }
   0x3   :  { %s26_s25 = sshll.u32 %s1586_s24, 4  ;;  %p1515_p0 = scmp.ne.s32.totalorder %s1997_s3, %s1514_s28  ;;  %s27_s25 = int_to_ptr.vmem [resolvable:$true] %s26_s25 }
   0x4   :  { %p1518_p1 = scmp.lt.u32.totalorder %s1514_s28, %s1997_s3 }
   0x6   :  { %p1520_p2 = pnand %p1518_p1, %p1515_p0 }
   0x8   :  { %1523 = shalt.err (!%p1520_p2)
}
   0x9   :  { %s1524_s10 = scalar_lea.vmem %s27_s25, 2048  ;;  %p1529_p4 = scmp.lt.s32.totalorder %s27_s25, %s27_s25 }
   0xa   :  { %p1525_p3 = scmp.ne.s32.totalorder %s27_s25, %s1524_s10  ;;  %p1530_p5 = scmp.lt.s32.totalorder %s1524_s10, %s1524_s10 }
   0xc   :  { %p1531_p6 = por %p1530_p5, %p1529_p4 }
   0xe   :  { %p1532_p7 = pnand %p1531_p6, %p1525_p3 }
  0x10   :  { %1535 = shalt.err (!%p1532_p7)
}
  0x11   :  { %s1587_s11 = smov 64   ;;  %s1588_s12 = smov 4  }
  0x12   :  { %32 = dma.hbm_to_vmem [thread:$0]  %s1997_s3, 2048, %s27_s25, [#allocation3], %s1587_s11, %s1587_s11, %s1588_s12  }
  0x13   :  { %s1589_s15 = smov [#allocation5]   ;;  %s1536_s19 = scalar_lea.hbm %s1999_s5, 1024 }
  0x14   :  { %s40_s16 = sshll.u32 %s1589_s15, 4  ;;  %p1537_p8 = scmp.ne.s32.totalorder %s1999_s5, %s1536_s19  ;;  %s41_s16 = int_to_ptr.vmem [resolvable:$true] %s40_s16 }
  0x15   :  { %p1540_p9 = scmp.lt.u32.totalorder %s1536_s19, %s1999_s5 }
  0x17   :  { %p1542_p10 = pnand %p1540_p9, %p1537_p8 }
  0x19   :  { %1545 = shalt.err (!%p1542_p10)
}
  0x1a   :  { %s1546_s24 = scalar_lea.vmem %s41_s16, 1024  ;;  %p1551_p12 = scmp.lt.s32.totalorder %s41_s16, %s41_s16 }
  0x1b   :  { %p1547_p11 = scmp.ne.s32.totalorder %s41_s16, %s1546_s24  ;;  %p1552_p13 = scmp.lt.s32.totalorder %s1546_s24, %s1546_s24 }
  0x1d   :  { %p1553_p0 = por %p1552_p13, %p1551_p12 }
  0x1f   :  { %p1554_p1 = pnand %p1553_p0, %p1547_p11 }
  0x21   :  { %1557 = shalt.err (!%p1554_p1)
}
  0x22   :  { %46 = dma.hbm_to_vmem [thread:$0]  %s1999_s5, 1024, %s41_s16, [#allocation6], %s1587_s11, %s1587_s11, %s1588_s12  }
  0x23   :  { %1580 = dma.done.wait [#allocation3], 2048  }
  0x24   :  { %1581 = vsyncadd [#allocation3], 4294965248 }
  0x25   :  { %1582 = dma.done.wait [#allocation6], 1024  }
  0x26   :  { %1583 = vsyncadd [#allocation6], 4294966272  ;;  %v1343_v0 = vld [vmem:[%s1995_s1 + $0x104] ss:$8 sps:$4 sm:$0xff]   ;;  %v1345_v1 = vld [vmem:[%s1995_s1 + $0x100] ss:$8 sps:$4 sm:$0xff]  }
  0x27   :  { %715 = vmatprep.subr.bf16.mxu0 %v1343_v0  ;;  %v1346_v2 = vld [vmem:[%s1995_s1 + $0x114] ss:$8 sps:$4 sm:$0xff]   ;;  %v1348_v3 = vld [vmem:[%s1995_s1 + $0x110] ss:$8 sps:$4 sm:$0xff]   ;;  %v1349_v4 = vld [vmem:[%s1995_s1 + $0x124] ss:$8 sps:$4 sm:$0xff]  }
  0x28   :  { %716 = vmatpush1.bf16.msra.mxu0 %v1345_v1  ;;  %v1351_v5 = vld [vmem:[%s1995_s1 + $0x120] ss:$8 sps:$4 sm:$0xff]   ;;  %v1352_v6 = vld [vmem:[%s1995_s1 + $0x134] ss:$8 sps:$4 sm:$0xff]   ;;  %v1354_v7 = vld [vmem:[%s1995_s1 + $0x130] ss:$8 sps:$4 sm:$0xff]  }
  0x29   :  { %717 = vmatprep.subr.bf16.mxu0 %v1346_v2  ;;  %v1355_v8 = vld [vmem:[%s1995_s1 + $0x144] ss:$8 sps:$4 sm:$0xff]   ;;  %v1357_v9 = vld [vmem:[%s1995_s1 + $0x140] ss:$8 sps:$4 sm:$0xff]   ;;  %v1358_v10 = vld [vmem:[%s1995_s1 + $0x154] ss:$8 sps:$4 sm:$0xff]  }
  0x2a   :  { %v1360_v11 = vld [vmem:[%s1995_s1 + $0x150] ss:$8 sps:$4 sm:$0xff]   ;;  %v1361_v12 = vld [vmem:[%s1995_s1 + $0x164] ss:$8 sps:$4 sm:$0xff]   ;;  %v1363_v15 = vld [vmem:[%s1995_s1 + $0x160] ss:$8 sps:$4 sm:$0xff]  }
  0x2b   :  { %v59_v13 = vld [vmem:[%s1994_s0 + $0x18] sm:$0xff]  ;;  %v1397_v17 = vld [vmem:[%s1995_s1 + $0x4] ss:$8 sps:$4 sm:$0xff]   ;;  %v1402_v20 = vld [vmem:[%s1995_s1] ss:$8 sps:$4 sm:$0xff]   ;;  %vm670_vm0 = vcmask 130048  }
  0x2c   :  { %718 = vmatpush1.bf16.msra.mxu0 %v1348_v3  ;;  %v66_v14 = vpack.c.bf16 %v59_v13, %v59_v13  ;;  %v1364_v16 = vld [vmem:[%s1995_s1 + $0x174] ss:$8 sps:$4 sm:$0xff]   ;;  %v1366_v18 = vld [vmem:[%s1995_s1 + $0x170] ss:$8 sps:$4 sm:$0xff]   ;;  %v1367_v19 = vld [vmem:[%s1995_s1 + $0x184] ss:$8 sps:$4 sm:$0xff]   ;;  %674 = vmatprep.subr.bf16.mxu1 %v1397_v17 }
  0x2d   :  { %719 = vmatprep.subr.bf16.mxu0 %v1349_v4  ;;  %v1403_v21 = vld [vmem:[%s1995_s1 + $0x14] ss:$8 sps:$4 sm:$0xff]   ;;  %675 = vmatpush1.bf16.msra.mxu1 %v1402_v20  ;;  %v1408_v22 = vld [vmem:[%s1995_s1 + $0x10] ss:$8 sps:$4 sm:$0xff]   ;;  %v1409_v23 = vld [vmem:[%s1995_s1 + $0x24] ss:$8 sps:$4 sm:$0xff]  }
  0x2e   :  { %747 = vmatprep.mubr.bf16.mxu0 %v66_v14  ;;  %676 = vmatprep.subr.bf16.mxu1 %v1403_v21  ;;  %v1369_v24 = vld [vmem:[%s1995_s1 + $0x180] ss:$8 sps:$4 sm:$0xff]   ;;  %v1370_v25 = vld [vmem:[%s1995_s1 + $0x194] ss:$8 sps:$4 sm:$0xff]   ;;  %v1372_v28 = vld [vmem:[%s1995_s1 + $0x190] ss:$8 sps:$4 sm:$0xff]  }
  0x2f   :  { %v1414_v26 = vld [vmem:[%s1995_s1 + $0x20] ss:$8 sps:$4 sm:$0xff]   ;;  %v1415_v27 = vld [vmem:[%s1995_s1 + $0x34] ss:$8 sps:$4 sm:$0xff]   ;;  %v1373_v29 = vld [vmem:[%s1995_s1 + $0x1a4] ss:$8 sps:$4 sm:$0xff]  }
  0x30   :  { %720 = vmatpush1.bf16.msra.mxu0 %v1351_v5  ;;  %v1420_v30 = vld [vmem:[%s1995_s1 + $0x30] ss:$8 sps:$4 sm:$0xff]   ;;  %v1421_v31 = vld [vmem:[%s1995_s1 + $0x44] ss:$8 sps:$4 sm:$0xff]   ;;  %v1375_v32 = vld [vmem:[%s1995_s1 + $0x1a0] ss:$8 sps:$4 sm:$0xff]  }
  0x31   :  { %721 = vmatprep.subr.bf16.mxu0 %v1352_v6  ;;  %677 = vmatpush1.bf16.msra.mxu1 %v1408_v22  ;;  %v1376_v33 = vld [vmem:[%s1995_s1 + $0x1b4] ss:$8 sps:$4 sm:$0xff]   ;;  %v1426_v34 = vld [vmem:[%s1995_s1 + $0x40] ss:$8 sps:$4 sm:$0xff]   ;;  %v1378_v36 = vld [vmem:[%s1995_s1 + $0x1b0] ss:$8 sps:$4 sm:$0xff]  }
  0x32   :  { %678 = vmatprep.subr.bf16.mxu1 %v1409_v23  ;;  %v1427_v35 = vld [vmem:[%s1995_s1 + $0x54] ss:$8 sps:$4 sm:$0xff]   ;;  %v1379_v37 = vld [vmem:[%s1995_s1 + $0x1c4] ss:$8 sps:$4 sm:$0xff]   ;;  %v1432_v38 = vld [vmem:[%s1995_s1 + $0x50] ss:$8 sps:$4 sm:$0xff]  }
  0x33   :  { %v1433_v39 = vld [vmem:[%s1995_s1 + $0x64] ss:$8 sps:$4 sm:$0xff]   ;;  %v1381_v40 = vld [vmem:[%s1995_s1 + $0x1c0] ss:$8 sps:$4 sm:$0xff]   ;;  %v1382_v41 = vld [vmem:[%s1995_s1 + $0x1d4] ss:$8 sps:$4 sm:$0xff]  }
  0x34   :  { %722 = vmatpush1.bf16.msra.mxu0 %v1354_v7  ;;  %v1438_v42 = vld [vmem:[%s1995_s1 + $0x60] ss:$8 sps:$4 sm:$0xff]   ;;  %v1439_v43 = vld [vmem:[%s1995_s1 + $0x74] ss:$8 sps:$4 sm:$0xff]   ;;  %v1384_v44 = vld [vmem:[%s1995_s1 + $0x1d0] ss:$8 sps:$4 sm:$0xff]  }
  0x35   :  { %723 = vmatprep.subr.bf16.mxu0 %v1355_v8  ;;  %679 = vmatpush1.bf16.msra.mxu1 %v1414_v26  ;;  %v1385_v45 = vld [vmem:[%s1995_s1 + $0x1e4] ss:$8 sps:$4 sm:$0xff]   ;;  %v1444_v46 = vld [vmem:[%s1995_s1 + $0x70] ss:$8 sps:$4 sm:$0xff]   ;;  %v1387_v48 = vld [vmem:[%s1995_s1 + $0x1e0] ss:$8 sps:$4 sm:$0xff]  }
  0x36   :  { %680 = vmatprep.subr.bf16.mxu1 %v1415_v27  ;;  %v1445_v47 = vld [vmem:[%s1995_s1 + $0x84] ss:$8 sps:$4 sm:$0xff]   ;;  %v1388_v49 = vld [vmem:[%s1995_s1 + $0x1f4] ss:$8 sps:$4 sm:$0xff]   ;;  %v1450_v50 = vld [vmem:[%s1995_s1 + $0x80] ss:$8 sps:$4 sm:$0xff]  }
  0x37   :  { %v1390_v51 = vld [vmem:[%s1995_s1 + $0x1f0] ss:$8 sps:$4 sm:$0xff]   ;;  %v1451_v52 = vld [vmem:[%s1995_s1 + $0x94] ss:$8 sps:$4 sm:$0xff]   ;;  %v1393_v54 = vld [vmem:[%s1995_s1 + $0x204] ss:$8 sps:$4 sm:$0xff]  }
  0x38   :  { %724 = vmatpush1.bf16.msra.mxu0 %v1357_v9  ;;  %v58_v53 = vld [vmem:[%s1994_s0 + $0x10] sm:$0xff]  ;;  %v1457_v56 = vld [vmem:[%s1995_s1 + $0xa4] ss:$8 sps:$4 sm:$0xff]   ;;  %v1391_v59 = vld [vmem:[%s1995_s1 + $0x200] ss:$8 sps:$4 sm:$0xff]   ;;  %vm1592_vm1 = vmmov 0  }
  0x39   :  { %725 = vmatprep.subr.bf16.mxu0 %v1358_v10  ;;  %681 = vmatpush1.bf16.msra.mxu1 %v1420_v30  ;;  %v1456_v55 = vld [vmem:[%s1995_s1 + $0x90] ss:$8 sps:$4 sm:$0xff]   ;;  %v65_v57 = vpack.c.bf16 %v58_v53, %v58_v53  ;;  %v61_v58 = vld [vmem:[%s1994_s0 + $0x28] sm:$0xff]  ;;  %v1396_v61 = vld [vmem:[%s1995_s1 + $0x214] ss:$8 sps:$4 sm:$0xff]   ;;  %s1593_s15 = smov [#allocation7]  }
  0x3a   :  { %682 = vmatprep.subr.bf16.mxu1 %v1421_v31  ;;  %v68_v60 = vpack.c.bf16 %v61_v58, %v61_v58  ;;  %v1462_v62 = vld [vmem:[%s1995_s1 + $0xa0] ss:$8 sps:$4 sm:$0xff]   ;;  %v1463_v63 = vld [vmem:[%s1995_s1 + $0xb4] ss:$8 sps:$4 sm:$0xff]   ;;  %v1394_v1 = vld [vmem:[%s1995_s1 + $0x210] ss:$8 sps:$4 sm:$0xff]  }
  0x3b   :  { %v57_v0 = vld [vmem:[%s1994_s0 + $0x8] sm:$0xff]  ;;  %v1468_v4 = vld [vmem:[%s1995_s1 + $0xb0] ss:$8 sps:$4 sm:$0xff]   ;;  %v1407_v7 = vld [vmem:[%s1995_s1 + $0x234] ss:$8 sps:$4 sm:$0xff]   ;;  %s1137_s16 = sshll.u32 %s1593_s15, 4  ;;  %s1138_s16 = int_to_ptr.vmem [resolvable:$true] %s1137_s16 }
  0x3c   :  { %726 = vmatpush1.bf16.msra.mxu0 %v1360_v11  ;;  %v64_v2 = vpack.c.bf16 %v57_v0, %v57_v0  ;;  %v1401_v3 = vld [vmem:[%s1995_s1 + $0x224] ss:$8 sps:$4 sm:$0xff]   ;;  %v1399_v6 = vld [vmem:[%s1995_s1 + $0x220] ss:$8 sps:$4 sm:$0xff]   ;;  %v1475_v9 = vld [vmem:[%s1995_s1 + $0xd4] ss:$8 sps:$4 sm:$0xff]   ;;  %p1563_p3 = scmp.lt.s32.totalorder %s1138_s16, %s1138_s16 }
  0x3d   :  { %727 = vmatprep.subr.bf16.mxu0 %v1361_v12  ;;  %683 = vmatpush1.bf16.msra.mxu1 %v1426_v34  ;;  %v1469_v5 = vld [vmem:[%s1995_s1 + $0xc4] ss:$8 sps:$4 sm:$0xff]   ;;  %v1474_v8 = vld [vmem:[%s1995_s1 + $0xc0] ss:$8 sps:$4 sm:$0xff]   ;;  %v1405_v10 = vld [vmem:[%s1995_s1 + $0x230] ss:$8 sps:$4 sm:$0xff]  }
  0x3e   :  { %684 = vmatprep.subr.bf16.mxu1 %v1427_v35  ;;  %706 = vmatprep.mubr.bf16.mxu1 %v64_v2  ;;  %v1413_v11 = vld [vmem:[%s1995_s1 + $0x244] ss:$8 sps:$4 sm:$0xff]   ;;  %v1411_v12 = vld [vmem:[%s1995_s1 + $0x240] ss:$8 sps:$4 sm:$0xff]   ;;  %v1480_v13 = vld [vmem:[%s1995_s1 + $0xd0] ss:$8 sps:$4 sm:$0xff]  }
  0x3f   :  { %v1481_v14 = vld [vmem:[%s1995_s1 + $0xe4] ss:$8 sps:$4 sm:$0xff]   ;;  %v1487_v17 = vld [vmem:[%s1995_s1 + $0xf4] ss:$8 sps:$4 sm:$0xff]   ;;  %v1489_v20 = vld [vmem:[%s1995_s1 + $0xf0] ss:$8 sps:$4 sm:$0xff]  }
  0x40   :  { %728 = vmatpush1.bf16.msra.mxu0 %v1363_v15  ;;  %v1419_v15 = vld [vmem:[%s1995_s1 + $0x254] ss:$8 sps:$4 sm:$0xff]   ;;  %v56_v21 = vld [vmem:[%s1994_s0] sm:$0xff]  ;;  %v1496_v35 = vld [vmem:[#allocation2 + $0x58] sm:$0xff]  }
  0x41   :  { %729 = vmatprep.subr.bf16.mxu0 %v1364_v16  ;;  %685 = vmatpush1.bf16.msra.mxu1 %v1432_v38  ;;  %v1486_v16 = vld [vmem:[%s1995_s1 + $0xe0] ss:$8 sps:$4 sm:$0xff]   ;;  %v1490_v22 = vld [vmem:[#allocation2 + $0x40] sm:$0xff]   ;;  %v1492_v27 = vld [vmem:[#allocation2 + $0x48] sm:$0xff]  }
  0x42   :  { %686 = vmatprep.subr.bf16.mxu1 %v1433_v39  ;;  %v1423_v23 = vld [vmem:[%s1995_s1 + $0x260] ss:$8 sps:$4 sm:$0xff]   ;;  %v1491_v26 = vld [vmem:[#allocation2] sm:$0xff]   ;;  %v1493_v30 = vld [vmem:[#allocation2 + $0x8] sm:$0xff]  }
  0x43   :  { %v1494_v31 = vld [vmem:[#allocation2 + $0x50] sm:$0xff]   ;;  %v1497_v38 = vld [vmem:[#allocation2 + $0x18] sm:$0xff]   ;;  %v1498_v39 = vld [vmem:[#allocation2 + $0x60] sm:$0xff]  }
  0x44   :  { %730 = vmatpush1.bf16.msra.mxu0 %v1366_v18  ;;  %v1417_v18 = vld [vmem:[%s1995_s1 + $0x250] ss:$8 sps:$4 sm:$0xff]   ;;  %v1495_v34 = vld [vmem:[#allocation2 + $0x10] sm:$0xff]   ;;  %v1505_v0 = vld [vmem:[#allocation2 + $0x38] sm:$0xff]  }
  0x45   :  { %731 = vmatprep.subr.bf16.mxu0 %v1367_v19  ;;  %687 = vmatpush1.bf16.msra.mxu1 %v1438_v42  ;;  %v1425_v19 = vld [vmem:[%s1995_s1 + $0x264] ss:$8 sps:$4 sm:$0xff]   ;;  %v1499_v42 = vld [vmem:[#allocation2 + $0x20] sm:$0xff]  }
  0x46   :  { %688 = vmatprep.subr.bf16.mxu1 %v1439_v43  ;;  %v1453_v43 = vld [vmem:[%s1995_s1 + $0x2b0] ss:$8 sps:$4 sm:$0xff]   ;;  %v1485_v53 = vld [vmem:[%s1995_s1 + $0x304] ss:$8 sps:$4 sm:$0xff]  }
  0x48   :  { %732 = vmatpush1.bf16.msra.mxu0 %v1369_v24  ;;  %v1431_v24 = vld [vmem:[%s1995_s1 + $0x274] ss:$8 sps:$4 sm:$0xff]  }
  0x49   :  { %733 = vmatprep.subr.bf16.mxu0 %v1370_v25  ;;  %689 = vmatpush1.bf16.msra.mxu1 %v1444_v46  ;;  %v63_v25 = vpack.c.bf16 %v56_v21, %v56_v21  ;;  %v1467_v46 = vld [vmem:[%s1995_s1 + $0x2d4] ss:$8 sps:$4 sm:$0xff]  }
  0x4a   :  { %690 = vmatprep.subr.bf16.mxu1 %v1445_v47  ;;  %v1465_v47 = vld [vmem:[%s1995_s1 + $0x2d0] ss:$8 sps:$4 sm:$0xff]  }
  0x4c   :  { %734 = vmatpush1.bf16.msra.mxu0 %v1372_v28  ;;  %v1429_v28 = vld [vmem:[%s1995_s1 + $0x270] ss:$8 sps:$4 sm:$0xff]  }
  0x4d   :  { %735 = vmatprep.subr.bf16.mxu0 %v1373_v29  ;;  %691 = vmatpush1.bf16.msra.mxu1 %v1450_v50  ;;  %v1437_v29 = vld [vmem:[%s1995_s1 + $0x284] ss:$8 sps:$4 sm:$0xff]   ;;  %v1479_v50 = vld [vmem:[%s1995_s1 + $0x2f4] ss:$8 sps:$4 sm:$0xff]  }
  0x4e   :  { %692 = vmatprep.subr.bf16.mxu1 %v1451_v52  ;;  %v60_v52 = vld [vmem:[%s1994_s0 + $0x20] sm:$0xff] }
  0x50   :  { %736 = vmatpush1.bf16.msra.mxu0 %v1375_v32  ;;  %v1435_v32 = vld [vmem:[%s1995_s1 + $0x280] ss:$8 sps:$4 sm:$0xff]  }
  0x51   :  { %737 = vmatprep.subr.bf16.mxu0 %v1376_v33  ;;  %693 = vmatpush1.bf16.msra.mxu1 %v1456_v55  ;;  %v1443_v33 = vld [vmem:[%s1995_s1 + $0x294] ss:$8 sps:$4 sm:$0xff]   ;;  %v1483_v55 = vld [vmem:[%s1995_s1 + $0x300] ss:$8 sps:$4 sm:$0xff]  }
  0x52   :  { %694 = vmatprep.subr.bf16.mxu1 %v1457_v56  ;;  %v1590_v56 = vmov 0  }
  0x54   :  { %738 = vmatpush1.bf16.msra.mxu0 %v1378_v36  ;;  %v1441_v36 = vld [vmem:[%s1995_s1 + $0x290] ss:$8 sps:$4 sm:$0xff]  }
  0x55   :  { %739 = vmatprep.subr.bf16.mxu0 %v1379_v37  ;;  %695 = vmatpush1.bf16.msra.mxu1 %v1462_v62  ;;  %v1449_v37 = vld [vmem:[%s1995_s1 + $0x2a4] ss:$8 sps:$4 sm:$0xff]  }
  0x56   :  { %696 = vmatprep.subr.bf16.mxu1 %v1463_v63  ;;  %v1503_v62 = vld [vmem:[#allocation2 + $0x30] sm:$0xff]   ;;  %v1504_v63 = vld [vmem:[#allocation2 + $0x78] sm:$0xff]  }
  0x58   :  { %740 = vmatpush1.bf16.msra.mxu0 %v1381_v40  ;;  %v1447_v40 = vld [vmem:[%s1995_s1 + $0x2a0] ss:$8 sps:$4 sm:$0xff]  }
  0x59   :  { %741 = vmatprep.subr.bf16.mxu0 %v1382_v41  ;;  %697 = vmatpush1.bf16.msra.mxu1 %v1468_v4  ;;  %v1455_v41 = vld [vmem:[%s1995_s1 + $0x2b4] ss:$8 sps:$4 sm:$0xff]  }
  0x5a   :  { %698 = vmatprep.subr.bf16.mxu1 %v1469_v5 }
  0x5c   :  { %742 = vmatpush1.bf16.msra.mxu0 %v1384_v44  ;;  %v1461_v44 = vld [vmem:[%s1995_s1 + $0x2c4] ss:$8 sps:$4 sm:$0xff]  }
  0x5d   :  { %743 = vmatprep.subr.bf16.mxu0 %v1385_v45  ;;  %699 = vmatpush1.bf16.msra.mxu1 %v1474_v8  ;;  %v1459_v45 = vld [vmem:[%s1995_s1 + $0x2c0] ss:$8 sps:$4 sm:$0xff]  }
  0x5e   :  { %700 = vmatprep.subr.bf16.mxu1 %v1475_v9  ;;  %v168_v9 = vld [vmem:[%s1996_s2] sm:$0x3] }
  0x60   :  { %744 = vmatpush1.bf16.msra.mxu0 %v1387_v48  ;;  %v1473_v48 = vld [vmem:[%s1995_s1 + $0x2e4] ss:$8 sps:$4 sm:$0xff]  }
  0x61   :  { %745 = vmatprep.subr.bf16.mxu0 %v1388_v49  ;;  %701 = vmatpush1.bf16.msra.mxu1 %v1480_v13  ;;  %v1471_v49 = vld [vmem:[%s1995_s1 + $0x2e0] ss:$8 sps:$4 sm:$0xff]  }
  0x62   :  { %702 = vmatprep.subr.bf16.mxu1 %v1481_v14 }
  0x64   :  { %746 = vmatpush1.bf16.msra.mxu0 %v1390_v51  ;;  %v1477_v51 = vld [vmem:[%s1995_s1 + $0x2f0] ss:$8 sps:$4 sm:$0xff]  }
  0x65   :  { %756 = vmatprep.subr.bf16.mxu0 %v1393_v54  ;;  %703 = vmatpush1.bf16.msra.mxu1 %v1486_v16  ;;  %v67_v54 = vpack.c.bf16 %v60_v52, %v60_v52 }
  0x66   :  { %704 = vmatprep.subr.bf16.mxu1 %v1487_v17 }
  0x67   :  { %748 = vmatmul.mubr.bf16.vlgmr.msra.gmra.mrb[0].mxu0 %v65_v57  ;;  %v62_v57 = vld [vmem:[%s1994_s0 + $0x30] sm:$0xff] }
  0x68   :  { %757 = vmatpush1.bf16.msra.mxu0 %v1391_v59  ;;  %788 = vmatprep.mubr.bf16.mxu0 %v68_v60  ;;  %v69_v58 = vpack.c.bf16 %v62_v57, %v62_v57  ;;  %v1500_v59 = vld [vmem:[#allocation2 + $0x68] sm:$0xff]  }
  0x69   :  { %758 = vmatprep.subr.bf16.mxu0 %v1396_v61  ;;  %705 = vmatpush1.bf16.msra.mxu1 %v1489_v20  ;;  %v1501_v60 = vld [vmem:[#allocation2 + $0x28] sm:$0xff]   ;;  %v1502_v61 = vld [vmem:[#allocation2 + $0x70] sm:$0xff]  }
  0x6a   :  { %1272 = vmatprep.subr.bf16.mxu1 %v1490_v22 }
  0x6c   :  { %759 = vmatpush1.bf16.msra.mxu0 %v1394_v1  ;;  %707 = vmatmul.mubr.bf16.vlgmr.msra.gmra.mrb[0].mxu1 %v63_v25  ;;  %v1591_v1 = vmov 0.0  }
  0x6d   :  { %760 = vmatprep.subr.bf16.mxu0 %v1401_v3  ;;  %1273 = vmatpush3.bf16.msra.mxu1 %v1491_v26  ;;  %v1507_v26 = vld [vmem:[#allocation5 + $0x8] sm:$0xff]  }
  0x6e   :  { %1274 = vmatprep.subr.bf16.mxu1 %v1492_v27  ;;  %v1508_v27 = vld [vmem:[#allocation5 + $0x10] sm:$0xff]  }
  0x70   :  { %761 = vmatpush1.bf16.msra.mxu0 %v1399_v6  ;;  %v170_v6 = vlaneseq }
  0x71   :  { %762 = vmatprep.subr.bf16.mxu0 %v1407_v7  ;;  %1275 = vmatpush3.bf16.msra.mxu1 %v1493_v30  ;;  %v1511_v30 = vld [vmem:[#allocation5 + $0x28] sm:$0xff]  }
  0x72   :  { %1276 = vmatprep.subr.bf16.mxu1 %v1494_v31  ;;  %v171_v7 = vshrl.u32 %v170_v6, 7  ;;  %v1512_v31 = vld [vmem:[#allocation5 + $0x30] sm:$0xff]  }
  0x74   :  { %763 = vmatpush1.bf16.msra.mxu0 %v1405_v10  ;;  %v172_v8 = vsub.s32 0, %v171_v7  ;;  %v176_v10 = vsub.s32 1, %v171_v7 }
  0x75   :  { %764 = vmatprep.subr.bf16.mxu0 %v1413_v11  ;;  %1277 = vmatpush3.bf16.msra.mxu1 %v1495_v34  ;;  %v1246_v34 = vld [vmem:[%s1998_s4] ss:$0 sm:$0xff]  ;;  %s1558_s4 = scalar_lea.vmem %s1138_s16, 128 }
  0x76   :  { %1278 = vmatprep.subr.bf16.mxu1 %v1496_v35  ;;  %v173_v11 = vrot.slane %v168_v9, %v172_v8  ;;  %p1559_p2 = scmp.ne.s32.totalorder %s1138_s16, %s1558_s4  ;;  %p1564_p4 = scmp.lt.s32.totalorder %s1558_s4, %s1558_s4 }
  0x78   :  { %765 = vmatpush1.bf16.msra.mxu0 %v1411_v12  ;;  %v177_v12 = vrot.slane %v168_v9, %v176_v10  ;;  %p1565_p5 = por %p1564_p4, %p1563_p3 }
  0x79   :  { %766 = vmatprep.subr.bf16.mxu0 %v1419_v15  ;;  %1279 = vmatpush3.bf16.msra.mxu1 %v1497_v38 }
  0x7a   :  { %1280 = vmatprep.subr.bf16.mxu1 %v1498_v39  ;;  %p1566_p6 = pnand %p1565_p5, %p1559_p2 }
  0x7c   :  { %767 = vmatpush1.bf16.msra.mxu0 %v1417_v18 }
  0x7d   :  { %768 = vmatprep.subr.bf16.mxu0 %v1425_v19  ;;  %1281 = vmatpush3.bf16.msra.mxu1 %v1499_v42  ;;  %v1263_v42 = vld [vmem:[%s2000_s6] ss:$0 sm:$0xff] }
  0x7e   :  { %1282 = vmatprep.subr.bf16.mxu1 %v1500_v59 }
  0x80   :  { %769 = vmatpush1.bf16.msra.mxu0 %v1423_v23 }
  0x81   :  { %770 = vmatprep.subr.bf16.mxu0 %v1431_v24  ;;  %1283 = vmatpush3.bf16.msra.mxu1 %v1501_v60  ;;  %v1506_v24 = vld [vmem:[#allocation5] sm:$0xff]  }
  0x82   :  { %1284 = vmatprep.subr.bf16.mxu1 %v1502_v61 }
  0x84   :  { %771 = vmatpush1.bf16.msra.mxu0 %v1429_v28  ;;  %v1509_v28 = vld [vmem:[#allocation5 + $0x18] sm:$0xff]  }
  0x85   :  { %772 = vmatprep.subr.bf16.mxu0 %v1437_v29  ;;  %1285 = vmatpush3.bf16.msra.mxu1 %v1503_v62  ;;  %v1510_v29 = vld [vmem:[#allocation5 + $0x20] sm:$0xff]  }
  0x86   :  { %1286 = vmatprep.subr.bf16.mxu1 %v1504_v63 }
  0x88   :  { %773 = vmatpush1.bf16.msra.mxu0 %v1435_v32  ;;  %v1513_v32 = vld [vmem:[#allocation5 + $0x38] sm:$0xff]  }
  0x89   :  { %774 = vmatprep.subr.bf16.mxu0 %v1443_v33  ;;  %1287 = vmatpush3.bf16.msra.mxu1 %v1505_v0 }
  0x8a   :  { %1303 = vmatprep.subr.bf16.mxu1 %v1591_v1 }
  0x8c   :  { %775 = vmatpush1.bf16.msra.mxu0 %v1441_v36 }
  0x8d   :  { %776 = vmatprep.subr.bf16.mxu0 %v1449_v37 }
  0x90   :  { %777 = vmatpush1.bf16.msra.mxu0 %v1447_v40 }
  0x91   :  { %778 = vmatprep.subr.bf16.mxu0 %v1455_v41 }
  0x94   :  { %779 = vmatpush1.bf16.msra.mxu0 %v1453_v43 }
  0x95   :  { %780 = vmatprep.subr.bf16.mxu0 %v1461_v44 }
  0x98   :  { %781 = vmatpush1.bf16.msra.mxu0 %v1459_v45 }
  0x99   :  { %782 = vmatprep.subr.bf16.mxu0 %v1467_v46 }
  0x9c   :  { %783 = vmatpush1.bf16.msra.mxu0 %v1465_v47 }
  0x9d   :  { %784 = vmatprep.subr.bf16.mxu0 %v1473_v48 }
  0xa0   :  { %785 = vmatpush1.bf16.msra.mxu0 %v1471_v49 }
  0xa1   :  { %786 = vmatprep.subr.bf16.mxu0 %v1479_v50 }
  0xa4   :  { %787 = vmatpush1.bf16.msra.mxu0 %v1477_v51 }
  0xa5   :  { %797 = vmatprep.subr.bf16.mxu0 %v1485_v53 }
  0xa7   :  { %789 = vmatmul.mubr.bf16.vlgmr.msra.gmra.mrb[0].mxu0 %v67_v54 }
  0xa8   :  { %798 = vmatpush1.bf16.msra.mxu0 %v1483_v55  ;;  %829 = vmatprep.mubr.bf16.mxu0 %v1590_v56 }
  0xb3   :  { %1245 = vmatmul.mubr.msk.bf16.vlgmr.msra.gmra.mrb[0].mxu0 %vm670_vm0, %v69_v58 }
 0x13f   :  { %v708_v2 = vpop.f32.mrb[0].mxu1 }
 0x140   :  { %v710_v3 = vpop.f32.mrb[1].mxu1  ;;  %v709_v13 = vadd.f32 %v708_v2, %v173_v11 }
 0x141   :  { %v712_v4 = vpop.f32.mrb[2].mxu1  ;;  %v711_v14 = vadd.f32 %v710_v3, %v177_v12 }
 0x142   :  { %v713_v5 = vpop.f32.mrb[3].mxu1 }
 0x186   :  { %v831_v15 = vpop.f32.mrb[0].mxu0 }
 0x187   :  { %v1324_v16 = vadd.f32 %v831_v15, %v709_v13  ;;  %v833_v17 = vpop.f32.mrb[1].mxu0 }
 0x188   :  { %v1326_v18 = vadd.f32 %v833_v17, %v711_v14  ;;  %v835_v19 = vpop.f32.mrb[2].mxu0 }
 0x189   :  { %v838_v20 = vmax.f32 %v1324_v16, 0.0  ;;  %v836_v21 = vpop.f32.mrb[3].mxu0 }
 0x18a   :  { %v839_v22 = vmax.f32 %v1326_v18, 0.0 }
 0x18b   :  { %v840_v25 = vpack.c.bf16 %v838_v20, %v838_v20 }
 0x18c   :  { %v841_v23 = vpack.c.bf16 %v839_v22, %v839_v22 }
 0x18e   :  { %1009 = vmatprep.mubr.bf16.mxu1 %v841_v23 }
 0x18f   :  { %1010 = vmatmul.mubr.bf16.vlgmr.msra.gmra.mrb[4].mxu1 %v840_v25 }
 0x190   :  { %1304 = vmatpush3.bf16.msra.mxu1 %v1506_v24  ;;  %1319 = vmatprep.mubr.msk.bf16.mxu1 %vm1592_vm1, %v1591_v1 }
 0x191   :  { %1305 = vmatprep.subr.bf16.mxu1 %v1591_v1 }
 0x194   :  { %1306 = vmatpush3.bf16.msra.mxu1 %v1507_v26 }
 0x195   :  { %1307 = vmatprep.subr.bf16.mxu1 %v1591_v1 }
 0x198   :  { %1308 = vmatpush3.bf16.msra.mxu1 %v1508_v27 }
 0x199   :  { %1309 = vmatprep.subr.bf16.mxu1 %v1591_v1 }
 0x19c   :  { %1310 = vmatpush3.bf16.msra.mxu1 %v1509_v28 }
 0x19d   :  { %1311 = vmatprep.subr.bf16.mxu1 %v1591_v1 }
 0x1a0   :  { %1312 = vmatpush3.bf16.msra.mxu1 %v1510_v29 }
 0x1a1   :  { %1313 = vmatprep.subr.bf16.mxu1 %v1591_v1 }
 0x1a4   :  { %1314 = vmatpush3.bf16.msra.mxu1 %v1511_v30 }
 0x1a5   :  { %1315 = vmatprep.subr.bf16.mxu1 %v1591_v1 }
 0x1a8   :  { %1316 = vmatpush3.bf16.msra.mxu1 %v1512_v31 }
 0x1a9   :  { %1317 = vmatprep.subr.bf16.mxu1 %v1591_v1 }
 0x1ac   :  { %1318 = vmatpush3.bf16.msra.mxu1 %v1513_v32 }
 0x262   :  { %v1288_v33 = vpop.f32.mrb[4].mxu1 }
 0x263   :  { %v1289_v35 = vpop.f32.mrb[5].mxu1 }
 0x264   :  { %v1290_v36 = vadd.f32 %v1289_v35, %v1288_v33  ;;  %v1291_v37 = vpop.f32.mrb[6].mxu1 }
 0x265   :  { %v1292_v38 = vpop.f32.mrb[7].mxu1 }
 0x266   :  { %v1012_v39 = vadd.f32 %v1290_v36, %v1246_v34 }
 0x268   :  { %v1017_v40 = vmax.f32 %v1012_v39, 0.0 }
 0x26a   :  { %v1018_v41 = vpack.c.bf16 %v1017_v40, %v1017_v40 }
 0x26c   :  { %1320 = vmatmul.mubr.bf16.vlgmr.msra.gmra.mrb[8].mxu1 %v1018_v41 }
 0x33f   :  { %v1124_v43 = vpop.f32.mrb[8].mxu1 }
 0x340   :  { %v1125_v44 = vadd.f32 %v1263_v42, %v1124_v43  ;;  %v1321_v45 = vpop.f32.mrb[9].mxu1 }
 0x341   :  { %v1127_v46 = vpop.f32.mrb[10].mxu1 }
 0x342   :  { %1130 = vst [vmem:[#allocation7] sm:$0xff] %v1125_v44  ;;  %v1322_v47 = vpop.f32.mrb[11].mxu1 }
 0x343   :  { %1569 = shalt.err (!%p1566_p6)
}
 0x344   :  { %s1570_s6 = scalar_lea.hbm %s2001_s7, 128 }
 0x345   :  { %p1571_p7 = scmp.ne.s32.totalorder %s2001_s7, %s1570_s6  ;;  %p1574_p8 = scmp.lt.u32.totalorder %s1570_s6, %s2001_s7 }
 0x347   :  { %p1576_p9 = pnand %p1574_p8, %p1571_p7 }
 0x349   :  { %1579 = shalt.err (!%p1576_p9)
}
 0x34a   :  { %1140 = dma.vmem_to_hbm [thread:$0]  %s1138_s16, 128, %s2001_s7, [#allocation4]  }
 0x34b   :  { %1584 = dma.done.wait [#allocation4], 128  }
 0x34c   :  { %1585 = vsyncadd [#allocation4], 4294967168 }
 0x34d   :  { %1144 = vsyncpa [#allocation3], 1 }
 0x34e   :  { %1145 = vsyncpa [#allocation6], 1 }
 0x34f   :  { %1146 = vsyncpa [#allocation4], 1 }

</bundles_post_ra>
